<compile_context>
chip_gen: v7x
topology: tpu7x:2x2x1
jax: 0.10.0
libtpu: 0.0.40
codegen_flags: <defaults>
</compile_context>

<pallas_src>
import functools

import jax
import jax.numpy as jnp
from jax import lax
from jax.experimental import pallas as pl
from jax.experimental.pallas import tpu as pltpu

EPS = 1e-5  # nn.InstanceNorm2d default eps (affine=False, no running stats)


def _tconv_in_relu_kernel(x_ref, w_ref, b_ref, mcol_ref, o_ref, *, H, W, Cin, Cout):
    """One batch element.

    x_ref:    (Cin, H*W)       bf16, row-major flattened input (lane index = y*W + x)
    w_ref:    (4*Cout, 4*Cin)  bf16, row block = output phase (py,px), col block = shift (dy,dx)
    b_ref:    (4*Cout, 1)      f32, bias tiled over the 4 output phases
    mcol_ref: (1, H*W)         bf16, 0.0 where x == W-1 else 1.0 (row-crossing mask)
    o_ref:    (4*Cout, H*W)    f32, out[(py*2+px)*Cout + co, y*W + x]
    """
    P = H * W
    xf = x_ref[...]                       # (Cin, P) bf16
    mcol = mcol_ref[...]                  # (1, P)   bf16

    def shifted(d):
        # out[:, k] = xf[:, k + d], zero-filled past the end (covers y == H-1).
        return jnp.concatenate([xf[:, d:], jnp.zeros((Cin, d), xf.dtype)], axis=1)

    s01 = shifted(1) * mcol               # input (y,   x+1), zero at x == W-1
    s10 = shifted(W)                      # input (y+1, x  ), zero at y == H-1
    s11 = shifted(W + 1) * mcol           # input (y+1, x+1)
    x4 = jnp.concatenate([xf, s01, s10, s11], axis=0)        # (4*Cin, P)

    # All 9 transposed-conv taps in a single MXU matmul (bf16 x bf16 -> f32 acc).
    res = jnp.dot(w_ref[...], x4, preferred_element_type=jnp.float32)
    res = res + b_ref[...]                                    # (4*Cout, P) f32

    # InstanceNorm2d (affine=False): per-channel stats over all 4*H*W output pixels,
    # computed in a single sweep (sum & sum-of-squares), all in f32.
    inv_n = 1.0 / float(4 * P)
    psum = jnp.sum(res, axis=1, keepdims=True)                # (4*Cout, 1)
    psq = jnp.sum(res * res, axis=1, keepdims=True)           # (4*Cout, 1)
    ch_sum = (psum[0:Cout] + psum[Cout:2 * Cout]
              + psum[2 * Cout:3 * Cout] + psum[3 * Cout:4 * Cout])   # (Cout, 1)
    ch_sq = (psq[0:Cout] + psq[Cout:2 * Cout]
             + psq[2 * Cout:3 * Cout] + psq[3 * Cout:4 * Cout])
    mean = ch_sum * inv_n
    var = ch_sq * inv_n - mean * mean                         # biased variance
    rstd = lax.rsqrt(var + EPS)
    mean4 = jnp.concatenate([mean, mean, mean, mean], axis=0)  # (4*Cout, 1)
    rstd4 = jnp.concatenate([rstd, rstd, rstd, rstd], axis=0)

    o_ref[...] = jnp.maximum((res - mean4) * rstd4, 0.0)       # ReLU


def _tap(parity, shift):
    """Kernel tap index along one axis feeding output parity `parity` from input shift `shift`.

    ConvTranspose2d(k=3, s=2, p=1): oh = 2*ih - 1 + kh  =>
      even output (parity 0): kh=1 with ih=y          (shift 0)
      odd  output (parity 1): kh=2 with ih=y (shift 0), kh=0 with ih=y+1 (shift 1)
    """
    if parity == 0 and shift == 0:
        return 1
    if parity == 1 and shift == 0:
        return 2
    if parity == 1 and shift == 1:
        return 0
    return -1  # (parity=0, shift=1): no tap


def transpose_conv_layer(x_nchw, weight, bias):
    """ConvTranspose2d(k=3, s=2, p=1, op=1) -> InstanceNorm2d -> ReLU.

    x_nchw: (N, Cin, H, W); weight: (Cin, Cout, 3, 3) (PyTorch layout); bias: (Cout,).
    Returns (N, Cout, 2H, 2W) float32.
    """
    N, Cin, H, W = x_nchw.shape
    wCin, Cout, KH, KW = weight.shape
    assert wCin == Cin and KH == 3 and KW == 3, "specialised to kernel_size=3, stride=2, p=1, op=1"
    P = H * W
    shifts = ((0, 0), (0, 1), (1, 0), (1, 1))   # (dy, dx) input shifts
    phases = ((0, 0), (0, 1), (1, 0), (1, 1))   # (py, px): output pixel (2y+py, 2x+px)

    # Pack the 9 taps into one (4*Cout, 4*Cin) matrix:
    #   w4t[p*Cout + co, s*Cin + ci] = weight[ci, co, kh(py,dy), kw(px,dx)]
    w4t = jnp.zeros((4 * Cout, 4 * Cin), jnp.float32)
    for pi, (py, px) in enumerate(phases):
        for si, (dy, dx) in enumerate(shifts):
            kh, kw = _tap(py, dy), _tap(px, dx)
            if kh < 0 or kw < 0:
                continue
            blk = weight[:, :, kh, kw].astype(jnp.float32).T          # (Cout, Cin)
            w4t = w4t.at[pi * Cout:(pi + 1) * Cout, si * Cin:(si + 1) * Cin].set(blk)
    w4t = w4t.astype(jnp.bfloat16)

    b4 = jnp.tile(bias.astype(jnp.float32), 4).reshape(4 * Cout, 1)

    xf = x_nchw.reshape(N, Cin, P).astype(jnp.bfloat16)               # 1x input, no dilation
    col_ids = jnp.arange(P, dtype=jnp.int32) % W
    mcol = (col_ids < (W - 1)).astype(jnp.bfloat16).reshape(1, P)

    kernel = functools.partial(_tconv_in_relu_kernel, H=H, W=W, Cin=Cin, Cout=Cout)
    out_k = pl.pallas_call(
        kernel,
        out_shape=jax.ShapeDtypeStruct((N, 4 * Cout, P), jnp.float32),
        grid=(N,),
        in_specs=[
            pl.BlockSpec((None, Cin, P), lambda n: (n, 0, 0)),
            pl.BlockSpec((4 * Cout, 4 * Cin), lambda n: (0, 0)),
            pl.BlockSpec((4 * Cout, 1), lambda n: (0, 0)),
            pl.BlockSpec((1, P), lambda n: (0, 0)),
        ],
        out_specs=pl.BlockSpec((None, 4 * Cout, P), lambda n: (n, 0, 0)),
        compiler_params=pltpu.CompilerParams(
            dimension_semantics=("parallel",),
            vmem_limit_bytes=32 * 1024 * 1024,   # generous vs the small block footprint
        ),
    )(xf, w4t, b4, mcol)

    # (N, (py, px, co), (y, x)) -> NCHW with oh = 2y + py, ow = 2x + px.
    out = out_k.reshape(N, 2, 2, Cout, H, W)
    out = jnp.transpose(out, (0, 3, 4, 1, 5, 2))        # (n, co, y, py, x, px)
    return out.reshape(N, Cout, 2 * H, 2 * W)


if __name__ == "__main__":
    # Small shapes consistent with the module: kernel_size=3, stride=2.
    N, Cin, Cout, H, W, K, STRIDE = 2, 4, 8, 16, 16, 3, 2

    key = jax.random.PRNGKey(0)
    k1, k2, k3 = jax.random.split(key, 3)
    x = jax.random.normal(k1, (N, Cin, H, W), jnp.float32)
    weight = jax.random.normal(k2, (Cin, Cout, K, K), jnp.float32) * 0.1
    bias = jax.random.normal(k3, (Cout,), jnp.float32) * 0.1

    out = transpose_conv_layer(x, weight, bias)
    out = jax.block_until_ready(out)
    assert out.shape == (N, Cout, 2 * H, 2 * W), out.shape

    # Pure-JAX reference. Operands are bf16-rounded to match the kernel's MXU path
    # (bf16 x bf16 multiplies, f32 accumulation); norm/ReLU stay f32.
    xb = x.astype(jnp.bfloat16).astype(jnp.float32)
    wb = weight.astype(jnp.bfloat16).astype(jnp.float32)
    w_oihw = jnp.transpose(wb[:, :, ::-1, ::-1], (1, 0, 2, 3))
    ref = lax.conv_general_dilated(
        xb, w_oihw, window_strides=(1, 1),
        padding=((K - 2, K - 1), (K - 2, K - 1)),   # (k-1-p, k-1-p+op) with p=1, op=1
        lhs_dilation=(STRIDE, STRIDE),
        dimension_numbers=("NCHW", "OIHW", "NCHW"),
        precision=lax.Precision.HIGHEST,
    ) + bias[None, :, None, None]
    mean = ref.mean(axis=(2, 3), keepdims=True)
    var = ref.var(axis=(2, 3), keepdims=True)
    ref = jnp.maximum((ref - mean) * lax.rsqrt(var + EPS), 0.0)

    err = float(jnp.max(jnp.abs(out - ref)))
    assert jnp.allclose(out, ref, atol=1e-3, rtol=1e-3), err
    print("KERNEL_OK")
</pallas_src>

<mosaic_0001>
module attributes {stable_mosaic.version = 11 : i64} {
  func.func @_tconv_in_relu_kernel(%arg0: i32, %arg1: memref<1x4x256xbf16, #tpu.memory_space<vmem>>, %arg2: memref<32x16xbf16, #tpu.memory_space<vmem>>, %arg3: memref<32x1xf32, #tpu.memory_space<vmem>>, %arg4: memref<1x256xbf16, #tpu.memory_space<vmem>>, %arg5: memref<1x32x256xf32, #tpu.memory_space<vmem>>) attributes {dimension_semantics = [#tpu.dimension_semantics<parallel>], iteration_bounds = array<i64: 2>, scalar_prefetch = 0 : i64, scratch_operands = 0 : i64, tpu.core_type = #tpu.core_type<tc>, window_params = [{transform_indices = @transform_0, window_bounds = array<i64: 1, 4, 256>}, {pipeline_mode = #tpu.pipeline_mode<synchronous>, transform_indices = @transform_1, window_bounds = array<i64: 32, 16>}, {pipeline_mode = #tpu.pipeline_mode<synchronous>, transform_indices = @transform_2, window_bounds = array<i64: 32, 1>}, {pipeline_mode = #tpu.pipeline_mode<synchronous>, transform_indices = @transform_3, window_bounds = array<i64: 1, 256>}, {transform_indices = @transform_4, window_bounds = array<i64: 1, 32, 256>}]} {
    %c0 = arith.constant 0 : index
    %c0_0 = arith.constant 0 : index
    %c0_1 = arith.constant 0 : index
    %0 = vector.load %arg1[%c0, %c0_0, %c0_1] : memref<1x4x256xbf16, #tpu.memory_space<vmem>>, vector<1x4x256xbf16>
    %1 = vector.shape_cast %0 : vector<1x4x256xbf16> to vector<4x256xbf16>
    %c0_2 = arith.constant 0 : index
    %c0_3 = arith.constant 0 : index
    %2 = vector.load %arg4[%c0_2, %c0_3] : memref<1x256xbf16, #tpu.memory_space<vmem>>, vector<1x256xbf16>
    %3 = vector.extract_strided_slice %1 {offsets = [0, 1], sizes = [4, 255], strides = [1, 1]} : vector<4x256xbf16> to vector<4x255xbf16>
    %cst = arith.constant 0.000000e+00 : bf16
    %4 = vector.broadcast %cst : bf16 to vector<4x1xbf16>
    %5 = tpu.concatenate %3, %4 in 1 : vector<4x255xbf16>, vector<4x1xbf16> -> vector<4x256xbf16>
    %6 = vector.broadcast %2 : vector<1x256xbf16> to vector<4x256xbf16>
    %7 = arith.mulf %5, %6 : vector<4x256xbf16>
    %8 = vector.extract_strided_slice %1 {offsets = [0, 16], sizes = [4, 240], strides = [1, 1]} : vector<4x256xbf16> to vector<4x240xbf16>
    %cst_4 = arith.constant 0.000000e+00 : bf16
    %9 = vector.broadcast %cst_4 : bf16 to vector<4x16xbf16>
    %10 = tpu.concatenate %8, %9 in 1 : vector<4x240xbf16>, vector<4x16xbf16> -> vector<4x256xbf16>
    %11 = vector.extract_strided_slice %1 {offsets = [0, 17], sizes = [4, 239], strides = [1, 1]} : vector<4x256xbf16> to vector<4x239xbf16>
    %cst_5 = arith.constant 0.000000e+00 : bf16
    %12 = vector.broadcast %cst_5 : bf16 to vector<4x17xbf16>
    %13 = tpu.concatenate %11, %12 in 1 : vector<4x239xbf16>, vector<4x17xbf16> -> vector<4x256xbf16>
    %14 = vector.broadcast %2 : vector<1x256xbf16> to vector<4x256xbf16>
    %15 = arith.mulf %13, %14 : vector<4x256xbf16>
    %16 = tpu.concatenate %1, %7, %10, %15 in 0 : vector<4x256xbf16>, vector<4x256xbf16>, vector<4x256xbf16>, vector<4x256xbf16> -> vector<16x256xbf16>
    %c0_6 = arith.constant 0 : index
    %c0_7 = arith.constant 0 : index
    %17 = vector.load %arg2[%c0_6, %c0_7] : memref<32x16xbf16, #tpu.memory_space<vmem>>, vector<32x16xbf16>
    %cst_8 = arith.constant dense<0.000000e+00> : vector<32x256xf32>
    %18 = tpu.matmul %17, %16, %cst_8 {dimension_numbers = #tpu.dot_dimension_numbers<[1], [0], [0], [1], [0, 0, 1, 1], [], []>} : vector<32x16xbf16>, vector<16x256xbf16>, vector<32x256xf32> -> vector<32x256xf32>
    %c0_9 = arith.constant 0 : index
    %c0_10 = arith.constant 0 : index
    %19 = vector.load %arg3[%c0_9, %c0_10] : memref<32x1xf32, #tpu.memory_space<vmem>>, vector<32x1xf32>
    %20 = vector.broadcast %19 : vector<32x1xf32> to vector<32x256xf32>
    %21 = arith.addf %18, %20 : vector<32x256xf32>
    %cst_11 = arith.constant dense<0.000000e+00> : vector<32xf32>
    %22 = vector.multi_reduction <add>, %21, %cst_11 [1] : vector<32x256xf32> to vector<32xf32>
    %23 = vector.shape_cast %22 : vector<32xf32> to vector<32x1xf32>
    %24 = arith.mulf %21, %21 : vector<32x256xf32>
    %cst_12 = arith.constant dense<0.000000e+00> : vector<32xf32>
    %25 = vector.multi_reduction <add>, %24, %cst_12 [1] : vector<32x256xf32> to vector<32xf32>
    %26 = vector.shape_cast %25 : vector<32xf32> to vector<32x1xf32>
    %27 = vector.extract_strided_slice %23 {offsets = [0, 0], sizes = [8, 1], strides = [1, 1]} : vector<32x1xf32> to vector<8x1xf32>
    %28 = vector.extract_strided_slice %23 {offsets = [8, 0], sizes = [8, 1], strides = [1, 1]} : vector<32x1xf32> to vector<8x1xf32>
    %29 = arith.addf %27, %28 : vector<8x1xf32>
    %30 = vector.extract_strided_slice %23 {offsets = [16, 0], sizes = [8, 1], strides = [1, 1]} : vector<32x1xf32> to vector<8x1xf32>
    %31 = arith.addf %29, %30 : vector<8x1xf32>
    %32 = vector.extract_strided_slice %23 {offsets = [24, 0], sizes = [8, 1], strides = [1, 1]} : vector<32x1xf32> to vector<8x1xf32>
    %33 = arith.addf %31, %32 : vector<8x1xf32>
    %34 = vector.extract_strided_slice %26 {offsets = [0, 0], sizes = [8, 1], strides = [1, 1]} : vector<32x1xf32> to vector<8x1xf32>
    %35 = vector.extract_strided_slice %26 {offsets = [8, 0], sizes = [8, 1], strides = [1, 1]} : vector<32x1xf32> to vector<8x1xf32>
    %36 = arith.addf %34, %35 : vector<8x1xf32>
    %37 = vector.extract_strided_slice %26 {offsets = [16, 0], sizes = [8, 1], strides = [1, 1]} : vector<32x1xf32> to vector<8x1xf32>
    %38 = arith.addf %36, %37 : vector<8x1xf32>
    %39 = vector.extract_strided_slice %26 {offsets = [24, 0], sizes = [8, 1], strides = [1, 1]} : vector<32x1xf32> to vector<8x1xf32>
    %40 = arith.addf %38, %39 : vector<8x1xf32>
    %cst_13 = arith.constant 9.765625E-4 : f32
    %41 = vector.broadcast %cst_13 : f32 to vector<8x1xf32>
    %42 = arith.mulf %33, %41 : vector<8x1xf32>
    %cst_14 = arith.constant 9.765625E-4 : f32
    %43 = vector.broadcast %cst_14 : f32 to vector<8x1xf32>
    %44 = arith.mulf %40, %43 : vector<8x1xf32>
    %45 = arith.mulf %42, %42 : vector<8x1xf32>
    %46 = arith.subf %44, %45 : vector<8x1xf32>
    %cst_15 = arith.constant 9.99999974E-6 : f32
    %47 = vector.broadcast %cst_15 : f32 to vector<8x1xf32>
    %48 = arith.addf %46, %47 : vector<8x1xf32>
    %49 = math.rsqrt %48 : vector<8x1xf32>
    %50 = tpu.concatenate %42, %42, %42, %42 in 0 : vector<8x1xf32>, vector<8x1xf32>, vector<8x1xf32>, vector<8x1xf32> -> vector<32x1xf32>
    %51 = tpu.concatenate %49, %49, %49, %49 in 0 : vector<8x1xf32>, vector<8x1xf32>, vector<8x1xf32>, vector<8x1xf32> -> vector<32x1xf32>
    %52 = vector.broadcast %50 : vector<32x1xf32> to vector<32x256xf32>
    %53 = arith.subf %21, %52 : vector<32x256xf32>
    %54 = vector.broadcast %51 : vector<32x1xf32> to vector<32x256xf32>
    %55 = arith.mulf %53, %54 : vector<32x256xf32>
    %cst_16 = arith.constant 0.000000e+00 : f32
    %56 = vector.broadcast %cst_16 : f32 to vector<32x256xf32>
    %57 = arith.maximumf %55, %56 : vector<32x256xf32>
    %c0_17 = arith.constant 0 : index
    %c0_18 = arith.constant 0 : index
    %c0_19 = arith.constant 0 : index
    %58 = vector.load %arg5[%c0_17, %c0_18, %c0_19] : memref<1x32x256xf32, #tpu.memory_space<vmem>>, vector<1x32x256xf32>
    %59 = vector.shape_cast %58 : vector<1x32x256xf32> to vector<32x256xf32>
    %60 = vector.shape_cast %57 : vector<32x256xf32> to vector<1x32x256xf32>
    tpu.vector_store %arg5[%c0_17, %c0_18, %c0_19], %60 {strides = array<i32>} : memref<1x32x256xf32, #tpu.memory_space<vmem>>, vector<1x32x256xf32>,
    return
  }
  func.func @transform_0(%arg0: i32) -> (i32, i32, i32) {
    %c0_i32 = arith.constant 0 : i32
    %c0_i32_0 = arith.constant 0 : i32
    %c0_i32_1 = arith.constant 0 : i32
    return %arg0, %c0_i32, %c0_i32_0 : i32, i32, i32
  }
  func.func @transform_1(%arg0: i32) -> (i32, i32) {
    %c0_i32 = arith.constant 0 : i32
    %c0_i32_0 = arith.constant 0 : i32
    %c0_i32_1 = arith.constant 0 : i32
    return %c0_i32, %c0_i32_0 : i32, i32
  }
  func.func @transform_2(%arg0: i32) -> (i32, i32) {
    %c0_i32 = arith.constant 0 : i32
    %c0_i32_0 = arith.constant 0 : i32
    %c0_i32_1 = arith.constant 0 : i32
    return %c0_i32, %c0_i32_0 : i32, i32
  }
  func.func @transform_3(%arg0: i32) -> (i32, i32) {
    %c0_i32 = arith.constant 0 : i32
    %c0_i32_0 = arith.constant 0 : i32
    %c0_i32_1 = arith.constant 0 : i32
    return %c0_i32, %c0_i32_0 : i32, i32
  }
  func.func @transform_4(%arg0: i32) -> (i32, i32, i32) {
    %c0_i32 = arith.constant 0 : i32
    %c0_i32_0 = arith.constant 0 : i32
    %c0_i32_1 = arith.constant 0 : i32
    return %arg0, %c0_i32, %c0_i32_0 : i32, i32, i32
  }
}

</mosaic_0001>

<bundles_post_ra>
// kernel: tpu_custom_call.1
= control target key start
LH: loop header
LB: loop body
LE: loop exit
PB: predicated region body
PF: predicated region fallthrough
CT: control target
= control target key end

     0   :  { %9 = vsyncpa [#allocation3], 0  ;;  %s934_s0 = inlined_call_operand.vmem [shape: bf16[2,4,256], index: 0, kind: input, shape index: {}]   ;;  %s935_s1 = inlined_call_operand.vmem [shape: bf16[32,16], index: 1, kind: input, shape index: {}]   ;;  %s936_s2 = inlined_call_operand.vmem [shape: f32[32,1], index: 2, kind: input, shape index: {}]   ;;  %s937_s3 = inlined_call_operand.vmem [shape: bf16[1,256], index: 3, kind: input, shape index: {}]   ;;  %s938_s4 = inlined_call_operand.hbm [shape: f32[2,32,256], index: 4, kind: output, shape index: {}]  }
   0x1   :  { %11 = vsyncpa [#allocation3 + $0x1], 0  ;;  %s742_s15 = smov 0   ;;  %s744_s16 = smov 0  }
   0x2   :  { %s746_s17 = smov 0   ;;  %s748_s18 = smov 0  }
   0x3 LB: > { %s763_s19 = sadd.s32 4294967295, %s707_s18   ;;  %s571_s20 = sadd.s32 4294967294, %s707_s18   ;;  %s707_s18 = sphi %s748_s18, %s944_s18   ;;  %s703_s17 = sphi %s746_s17, %s943_s17   ;;  %s699_s16 = sphi %s744_s16, %s942_s16   ;;  %s695_s15 = sphi %s742_s15, %s941_s15  }
   0x4   : > { %s767_s21 = sadd.s32 1, %s707_s18   ;;  %s113_s22 = sadd.s32 1, %s703_s17 }
   0x5   : > { %s110_s23 = ssub.s32 %s707_s18, %s767_s21  ;;  %p123_p0 = scmp.ne.s32.totalorder %s703_s17, %s699_s16 }
   0x6   : > { %p111_p1 = scmp.eq.s32.totalorder %s110_s23, 0  ;;  %p124_p2 = scmp.eq.s32.totalorder %s763_s19, 1 }
   0x7   : > { %p129_p3 = scmp.ne.s32.totalorder %s699_s16, %s695_s15  ;;  %p130_p4 = scmp.eq.s32.totalorder %s571_s20, 1 }
   0x8   : > { %s778_s24 = scalar_select %p111_p1, %s703_s17, %s113_s22  }
   0x9   : > { %p780_p5 = por %p124_p2, %p123_p0  ;;  %p784_p6 = por %p130_p4, %p129_p3 }
   0xa   : > { %p574_p7 = scmp.ge.s32.totalorder %s707_s18, 1  ;;  %p165_p8 = scmp.lt.s32.totalorder %s707_s18, 3 }
   0xc   : > { %p166_p9 = pnand %p574_p7, %p165_p8 }
   0xd   : > { %p191_p10 = scmp.lt.s32.totalorder (!%p166_p9), %s763_s19, 1  ;;  %s709_s6 = smov (!%p166_p9), 127   ;;  %v711_v2 = vmov (!%p166_p9), 0   ;;  %v315_v3 = vld [vmem:[%s936_s2] sm:$0xff] (!%p166_p9)  ;;  %v316_v4 = vld [vmem:[%s936_s2 + $0x8] sm:$0xff] (!%p166_p9)  ;;  %v318_v5 = vld [vmem:[%s936_s2 + $0x18] sm:$0xff] (!%p166_p9)  ;;  %v232_v9 = vlaneseq (!%p166_p9) }
   0xe   : > { %169 = sbr.rel (%p166_p9) target bundleno = 701 (0x2bd), region = 36  ;;  %s710_s7 = smov (!%p166_p9), 111   ;;  %388 = vmatprep.mubr.bf16.mxu0 (!%p166_p9), %v711_v2  ;;  %398 = vmatprep.mubr.bf16.mxu1 (!%p166_p9), %v711_v2  ;;  %v317_v6 = vld [vmem:[%s936_s2 + $0x10] sm:$0xff] (!%p166_p9)  ;;  %v713_v7 = vmov (!%p166_p9), 1966171168   ;;  %vm272_vm0 = vcmask (!%p166_p9), 908288  }
   0xf   : > { %640 = vset.pattern.permute.xlu1 (!%p166_p9), %v711_v2  ;;  %639 = vset.pattern.permute.xlu0 (!%p166_p9), %v711_v2  ;;  %s712_s8 = smov (!%p166_p9), 112   ;;  %v230_v8 = vunpack.c.l.s4 (!%p166_p9), %v713_v7  ;;  %v233_v11 = vshrl.u32 (!%p166_p9), %v232_v9, 7  ;;  %v579_v12 = vld.sshfl [vmem:[%s937_s3] sm:$0x11 pattern:$0x75316420] (!%p166_p9) }
  0x10   : > { %v228_v13 = vcombine.high (!%p166_p9), %v579_v12, %v579_v12  ;;  %vm212_vm1 = vcmask (!%p166_p9), 1039360   ;;  %vm263_vm2 = vcmask (!%p166_p9), 916480   ;;  %vm292_vm3 = vcmask (!%p166_p9), 1041408   ;;  %v641_v50 = vld [vmem:[%s935_s1] sm:$0xff] (!%p166_p9)   ;;  %v642_v51 = vld [vmem:[%s935_s1 + $0x8] sm:$0xff] (!%p166_p9)   ;;  %s714_s20 = smov (!%p166_p9), [#allocation2]  }
  0x11   : > { %v231_v10 = vunpack.c.0.s8 (!%p166_p9), %v230_v8  ;;  %v248_v17 = vsub.s32 (!%p166_p9), 0, %v233_v11  ;;  %vm299_vm4 = vcmask (!%p166_p9), 1043456   ;;  %vm304_vm5 = vcmask (!%p166_p9), 1045504   ;;  %s649_s22 = sshll.u32 (!%p166_p9), %s714_s20, 4  ;;  %s650_s22 = int_to_ptr.vmem [resolvable:$false] %s649_s22 }
  0x12   : > { %vm349_vm6 = vcmask (!%p166_p9), 130048   ;;  %s651_s23 = scalar_lea.vmem (!%p166_p9), %s650_s22, 2048 }
  0x13   : > { %v234_v14 = vsub.s32 (!%p166_p9), %v231_v10, %v233_v11 }
  0x15   : > { %s192_s27 = scalar_select %p191_p10, %s763_s19, 1  ;;  %v242_v15 = vrot.slane %v228_v13, %v234_v14  ;;  %v235_v16 = vrot.slane %v579_v12, %v234_v14 }
  0x17   : > { %s589_s28 = sshll.u32 %s192_s27, 2  ;;  %v251_v18 = vpack.i.b16 %v242_v15, %v242_v15  ;;  %v244_v19 = vpack.i.b16 %v235_v16, %v235_v16 }
  0x18   : > { %s195_s5 = scalar_lea.vmem %s934_s0, %s589_s28 }
  0x19   : > { %v795_v0 = vld.sshfl [vmem:[%s195_s5] sm:$0x33 pattern:$0x76325410]  ;;  %v256_v21 = vrot.slane %v251_v18, %v248_v17  ;;  %v249_v23 = vrot.slane %v244_v19, %v248_v17 }
  0x1a   : > { %208 = vrot.lane.b32.xlu0 %v795_v0, %s709_s6  ;;  %v207_v1 = vcombine.high %v795_v0, %v795_v0 }
  0x1c   : > { %270 = vrot.lane.b32.xlu1 %v207_v1, %s710_s7 }
  0x1e   : > { %210 = vrot.lane.b32.xlu0 %v207_v1, %s709_s6  ;;  %s188_s6 = sand.u32 1, %s699_s16  }
  0x20   : > { %261 = vrot.lane.b32.xlu1 %v207_v1, %s712_s8 }
  0x22   : > { %268 = vrot.lane.b32.xlu0 %v795_v0, %s710_s7  ;;  %s575_s7 = sshll.u32 %s188_s6, 6 }
  0x23   : > { %s190_s9 = scalar_lea.vmem [#allocation2], %s575_s7 }
  0x24   : > { %259 = vrot.lane.b32.xlu1 %v795_v0, %s712_s8  ;;  %s590_s8 = sshll.u32 %s763_s19, 10  ;;  %s509_s10 = sshll.u32 %s190_s9, 4  ;;  %s889_s10 = int_to_ptr.vmem [resolvable:$true] %s509_s10 }
  0x25   : > { %s887_s13 = scalar_lea.hbm %s938_s4, %s590_s8  ;;  %s893_s19 = scalar_lea.sflag [#allocation3], %s188_s6 }
  0x26   : > { %321 = vperm.xlu0 %639, %v315_v3   ;;  %s645_s14 = scalar_lea.vmem %s889_s10, 1024  ;;  %p652_p0 = scmp.lt.s32.totalorder %s889_s10, %s650_s22 }
  0x27   : > { %p646_p11 = scmp.ne.s32.totalorder %s889_s10, %s645_s14  ;;  %p653_p1 = scmp.lt.s32.totalorder %s651_s23, %s645_s14 }
  0x28   : > { %326 = vperm.xlu1 %640, %v316_v4  }
  0x29   : > { %p647_p12 = pnand %p646_p11, %p780_p5  ;;  %p654_p2 = por %p653_p1, %p652_p0 }
  0x2a   : > { %336 = vperm.xlu0 %639, %v318_v5  }
  0x2b   : > { %p648_p13 = pneg %p647_p12 }
  0x2c   : > { %331 = vperm.xlu1 %640, %v317_v6  }
  0x2d   : > { %p655_p3 = pnand %p654_p2, %p648_p13 }
  0x8c   : > { %v209_v20 = vpop.permute.xlu0 %208 }
  0x8e   : > { %v271_v22 = vpop.permute.xlu1 %270 }
  0x8f   : > { %v277_v24 = vsel %vm272_vm0, %v271_v22, 0 }
  0x90   : > { %v211_v25 = vpop.permute.xlu0 %210  ;;  %v280_v28 = vmul.bf16 %v277_v24, %v256_v21 }
  0x91   : > { %v213_v26 = vsel %vm212_vm1, %v209_v20, %v211_v25  ;;  %v218_v27 = vsel %vm212_vm1, %v211_v25, 0 }
  0x92   : > { %v257_v29 = vmul.bf16 %v249_v23, %v213_v26  ;;  %v258_v30 = vmul.bf16 %v256_v21, %v218_v27  ;;  %v262_v31 = vpop.permute.xlu1 %261  ;;  %v291_v38 = vrot.slane %v280_v28, 2 }
  0x93   : > { %v267_v32 = vsel %vm263_vm2, %v262_v31, 0 }
  0x94   : > { %v284_v33 = vrot.slane %v258_v30, 6  ;;  %v287_v34 = vrot.slane %v267_v32, 4  ;;  %v269_v35 = vpop.permute.xlu0 %268  ;;  %v283_v36 = vrot.slane %v257_v29, 6 }
  0x95   : > { %v273_v37 = vsel %vm272_vm0, %v269_v35, %v271_v22 }
  0x96   : > { %v279_v39 = vmul.bf16 %v273_v37, %v249_v23  ;;  %v260_v40 = vpop.permute.xlu1 %259  ;;  %v298_v41 = vsel %vm292_vm3, %v207_v1, %v284_v33  ;;  %v295_v47 = vsel %vm292_vm3, %v795_v0, %v283_v36 }
  0x97   : > { %v264_v42 = vsel %vm263_vm2, %v260_v40, %v262_v31  ;;  %v303_v43 = vsel %vm299_vm4, %v298_v41, %v287_v34 }
  0x98   : > { %v290_v44 = vrot.slane %v279_v39, 2  ;;  %v286_v45 = vrot.slane %v264_v42, 4  ;;  %v309_v46 = vsel %vm304_vm5, %v303_v43, %v291_v38 }
  0x99   : > { %356 = vmatprep.subr.bf16.mxu0 %v309_v46  ;;  %591 = vmatprep.subr.bf16.mxu1 %v309_v46 }
  0x9a   : > { %v301_v48 = vsel %vm299_vm4, %v295_v47, %v286_v45 }
  0x9b   : > { %v306_v49 = vsel %vm304_vm5, %v301_v48, %v290_v44 }
  0x9c   : > { %357 = vmatpush1.bf16.msra.mxu0 %v306_v49  ;;  %592 = vmatpush1.bf16.msra.mxu1 %v306_v49 }
  0x9f   : > { %582 = vmatmul.mubr.msk.bf16.vlgmr.msra.gmra.mrb[0].mxu0 %vm349_vm6, %v641_v50  ;;  %583 = vmatmul.mubr.msk.bf16.vlgmr.msra.gmra.mrb[0].mxu1 %vm349_vm6, %v642_v51 }
  0xa5   : > { %v322_v53 = vpop.permute.xlu0 %321 }
  0xa7   : > { %v327_v52 = vpop.permute.xlu1 %326 }
  0xa9   : > { %v337_v5 = vpop.permute.xlu0 %336 }
  0xab   : > { %v332_v54 = vpop.permute.xlu1 %331 }
 0x172   : > { %v390_v55 = vpop.f32.mrb[0].mxu0  ;;  %v400_v56 = vpop.f32.mrb[0].mxu1 }
 0x173   : > { %v832_v57 = vadd.f32 %v390_v55, %v322_v53  ;;  %v834_v58 = vadd.f32 %v400_v56, %v332_v54  ;;  %v392_v59 = vpop.f32.mrb[1].mxu0  ;;  %v402_v60 = vpop.f32.mrb[1].mxu1 }
 0x174   : > { %v836_v61 = vadd.f32 %v392_v59, %v322_v53  ;;  %v838_v62 = vadd.f32 %v402_v60, %v332_v54  ;;  %v394_v63 = vpop.f32.mrb[2].mxu0  ;;  %v404_v0 = vpop.f32.mrb[2].mxu1 }
 0x175   : > { %v396_v1 = vpop.f32.mrb[3].mxu0  ;;  %v406_v2 = vpop.f32.mrb[3].mxu1  ;;  %v421_v3 = vmul.f32 %v832_v57, %v832_v57  ;;  %v842_v4 = vadd.f32 %v394_v63, %v327_v52  ;;  %v852_v10 = vadd.f32 %v404_v0, %v337_v5  ;;  %v425_v16 = vmul.f32 %v834_v58, %v834_v58 }
 0x176   : > { %v844_v6 = vadd.f32 %v396_v1, %v327_v52  ;;  %v415_v7 = vadd.f32 %v838_v62, %v834_v58  ;;  %v409_v8 = vadd.f32 %v836_v61, %v832_v57  ;;  %v422_v9 = vmul.f32 %v836_v61, %v836_v61 }
 0x177   : > { %v854_v12 = vadd.f32 %v406_v2, %v337_v5  ;;  %v423_v14 = vmul.f32 %v842_v4, %v842_v4  ;;  %v426_v17 = vmul.f32 %v838_v62, %v838_v62  ;;  %v427_v20 = vmul.f32 %v852_v10, %v852_v10 }
 0x178   : > { %416 = vadd.xlane.f32.xlu0 %v415_v7  ;;  %410 = vadd.xlane.f32.xlu1 %v409_v8  ;;  %v429_v11 = vadd.f32 %v422_v9, %v421_v3  ;;  %v412_v13 = vadd.f32 %v844_v6, %v842_v4  ;;  %v424_v15 = vmul.f32 %v844_v6, %v844_v6 }
 0x179   : > { %v418_v19 = vadd.f32 %v854_v12, %v852_v10  ;;  %v428_v21 = vmul.f32 %v854_v12, %v854_v12  ;;  %v435_v22 = vadd.f32 %v426_v17, %v425_v16 }
 0x17a   : > { %v432_v18 = vadd.f32 %v424_v15, %v423_v14 }
 0x17b   : > { %v438_v23 = vadd.f32 %v428_v21, %v427_v20 }
 0x17c   : > { %413 = vadd.xlane.f32.xlu0 %v412_v13  ;;  %430 = vadd.xlane.f32.xlu1 %v429_v11 }
 0x180   : > { %433 = vadd.xlane.f32.xlu0 %v432_v18  ;;  %419 = vadd.xlane.f32.xlu1 %v418_v19 }
 0x184   : > { %436 = vadd.xlane.f32.xlu0 %v435_v22  ;;  %439 = vadd.xlane.f32.xlu1 %v438_v23 }
 0x205   : > { %v411_v24 = vpop.xlane.xlu1 %410  ;;  %v417_v25 = vpop.xlane.xlu0 %416 }
 0x209   : > { %v431_v26 = vpop.xlane.xlu1 %430  ;;  %v414_v27 = vpop.xlane.xlu0 %413 }
 0x20a   : > { %v441_v28 = vadd.f32 %v414_v27, %v411_v24 }
 0x20c   : > { %v442_v29 = vadd.f32 %v441_v28, %v417_v25 }
 0x20d   : > { %v420_v30 = vpop.xlane.xlu1 %419  ;;  %v434_v31 = vpop.xlane.xlu0 %433 }
 0x20e   : > { %v443_v32 = vadd.f32 %v442_v29, %v420_v30  ;;  %v444_v34 = vadd.f32 %v434_v31, %v431_v26 }
 0x210   : > { %v447_v33 = vmul.f32 0.0009765625, %v443_v32 }
 0x211   : > { %v437_v35 = vpop.xlane.xlu0 %436  ;;  %v440_v37 = vpop.xlane.xlu1 %439 }
 0x212   : > { %v445_v36 = vadd.f32 %v444_v34, %v437_v35  ;;  %455 = vperm.xlu0 %639, %v447_v33   ;;  %v449_v39 = vmul.f32 %v447_v33, %v447_v33 }
 0x214   : > { %v446_v38 = vadd.f32 %v445_v36, %v440_v37 }
 0x216   : > { %v448_v40 = vmul.f32 0.0009765625, %v446_v38 }
 0x218   : > { %v450_v41 = vsub.f32 %v448_v40, %v449_v39 }
 0x21a   : > { %v451_v42 = vadd.f32 1e-05, %v450_v41 }
 0x21c   : > { %643 = vrsqrt.f32 %v451_v42 }
 0x226   : > { %v644_v43 = vpop.eup %643 }
 0x227   : > { %468 = vperm.xlu1 %640, %v644_v43  }
 0x291   : > { %v456_v44 = vpop.permute.xlu0 %455 }
 0x292   : > { %v458_v45 = vsub.f32 %v832_v57, %v456_v44  ;;  %v459_v46 = vsub.f32 %v836_v61, %v456_v44  ;;  %v460_v47 = vsub.f32 %v842_v4, %v456_v44  ;;  %v461_v48 = vsub.f32 %v844_v6, %v456_v44 }
 0x293   : > { %v462_v49 = vsub.f32 %v834_v58, %v456_v44  ;;  %v463_v50 = vsub.f32 %v838_v62, %v456_v44  ;;  %v464_v51 = vsub.f32 %v852_v10, %v456_v44  ;;  %v465_v52 = vsub.f32 %v854_v12, %v456_v44 }
 0x2a6   : > { %v469_v53 = vpop.permute.xlu1 %468 }
 0x2a7   : > { %v471_v54 = vmul.f32 %v469_v53, %v458_v45  ;;  %v472_v55 = vmul.f32 %v469_v53, %v459_v46  ;;  %v473_v56 = vmul.f32 %v469_v53, %v460_v47  ;;  %v474_v57 = vmul.f32 %v469_v53, %v461_v48 }
 0x2a8   : > { %v475_v59 = vmul.f32 %v469_v53, %v462_v49  ;;  %v476_v60 = vmul.f32 %v469_v53, %v463_v50  ;;  %v477_v61 = vmul.f32 %v469_v53, %v464_v51  ;;  %v478_v63 = vmul.f32 %v469_v53, %v465_v52 }
 0x2a9   : > { %v479_v0 = vmax.f32 %v471_v54, 0.0  ;;  %v480_v58 = vmax.f32 %v472_v55, 0.0  ;;  %v481_v1 = vmax.f32 %v473_v56, 0.0  ;;  %v482_v62 = vmax.f32 %v474_v57, 0.0 }
 0x2aa   : > { %v483_v2 = vmax.f32 %v475_v59, 0.0  ;;  %v484_v3 = vmax.f32 %v476_v60, 0.0  ;;  %v485_v4 = vmax.f32 %v477_v61, 0.0  ;;  %v486_v5 = vmax.f32 %v478_v63, 0.0 }
 0x2ab   : > { %487 = vst [vmem:[%s190_s9] sm:$0xff] %v479_v0  ;;  %488 = vst [vmem:[%s190_s9 + $0x8] sm:$0xff] %v480_v58 }
 0x2ac   : > { %489 = vst [vmem:[%s190_s9 + $0x10] sm:$0xff] %v481_v1  ;;  %490 = vst [vmem:[%s190_s9 + $0x18] sm:$0xff] %v482_v62 }
 0x2ad   : > { %491 = vst [vmem:[%s190_s9 + $0x20] sm:$0xff] %v483_v2  ;;  %492 = vst [vmem:[%s190_s9 + $0x28] sm:$0xff] %v484_v3 }
 0x2ae   : > { %493 = vst [vmem:[%s190_s9 + $0x30] sm:$0xff] %v485_v4  ;;  %494 = vst [vmem:[%s190_s9 + $0x38] sm:$0xff] %v486_v5 }
 0x2af   : > { %658 = shalt.err (!%p655_p3)
}
 0x2b0   : > { %s659_s27 = scalar_lea.hbm %s887_s13, 1024  ;;  %s663_s30 = scalar_lea.hbm %s938_s4, 2048 }
 0x2b1   : > { %p660_p4 = scmp.ne.s32.totalorder %s887_s13, %s659_s27  ;;  %p664_p9 = scmp.lt.u32.totalorder %s887_s13, %s938_s4 }
 0x2b2   : > { %p665_p10 = scmp.lt.u32.totalorder %s663_s30, %s659_s27  ;;  %p667_p12 = scmp.lt.u32.totalorder %s659_s27, %s887_s13 }
 0x2b3   : > { %p661_p7 = pnand %p660_p4, %p780_p5 }
 0x2b4   : > { %p666_p11 = por %p665_p10, %p664_p9 }
 0x2b5   : > { %p662_p8 = pneg %p661_p7 }
 0x2b6   : > { %p668_p13 = por %p667_p12, %p666_p11 }
 0x2b8   : > { %p669_p0 = pnand %p668_p13, %p662_p8 }
 0x2ba   : > { %672 = shalt.err (!%p669_p0)
}
 0x2bb   : > { %s715_s7 = smov 256   ;;  %s716_s8 = smov 16  }
 0x2bc   : > { %593 = dma.vmem_to_hbm [thread:$0]  (%p780_p5), %s889_s10, 1024, %s887_s13, %s893_s19, %s715_s7, %s715_s7, %s716_s8  }
 0x2bd PF: > { %p599_p1 = scmp.ge.s32.totalorder %s707_s18, 2  ;;  %s524_s9 = sand.u32 1, %s695_s15  }
 0x2be   : > { %s525_s11 = scalar_lea.sflag [#allocation3], %s524_s9 }
 0x2bf   : > { %p596_p2 = pnand %p599_p1, %p784_p6 }
 0x2c1   : > { %690 = dma.done.wait (!%p596_p2), %s525_s11, 1024  }
 0x2c2   : > { %692 = vsyncadd (!%p596_p2), %s525_s11, 4294966272  ;;  %p14_p3 = scmp.ge.s32.totalorder %s767_s21, 4   ;;  %s941_s15 = smov %s699_s16 }
 0x2c3   : > { %s942_s16 = smov %s703_s17  ;;  %s943_s17 = smov %s778_s24 }
 0x2c4   : > { %s944_s18 = smov %s767_s21  ;;  %16 = sbr.rel (!%p14_p3) target bundleno = 3 (0x3), region = 71 }
 0x2cb   :  { %530 = vsyncpa [#allocation3], 1 }
 0x2cc   :  { %532 = vsyncpa [#allocation3 + $0x1], 1 }

</bundles_post_ra>
